<compile_context>
chip_gen: v7x
topology: tpu7x:2x2x1
jax: 0.10.0
libtpu: 0.0.40
codegen_flags: <defaults>
</compile_context>

<pallas_src>
import jax
import jax.numpy as jnp
from jax.experimental import pallas as pl
from jax.experimental.pallas import tpu as pltpu


def _conv1x1_kernel(x_ref, w_ref, b_ref, o_ref):
    # x_ref: (M, C_in) f32, w_ref: (C_in, C_out) f32 or bf16,
    # b_ref: (1, C_out) f32, o_ref: (M, C_out) f32 (unpadded real output).
    x = x_ref[...].astype(w_ref.dtype)          # no-op for the f32 path
    acc = jnp.dot(x, w_ref[...], preferred_element_type=jnp.float32)
    o_ref[...] = (acc + b_ref[...]).astype(o_ref.dtype)


def make_conv2d_1x1(weight, bias, param_dtype=jnp.float32):
    """Prepare parameters ONCE (transpose + optional bf16 cast) and return a
    jitted forward for a 1x1 stride-1 conv on NCHW input.

    weight: (C_out, C_in, 1, 1)  -- PyTorch layout
    bias:   (C_out,)
    param_dtype: jnp.float32 (default) or jnp.bfloat16 (halves weight DMA;
                 recommended on v5e, f32 accumulation is kept either way).
    """
    c_out, c_in = weight.shape[0], weight.shape[1]

    # (C_out, C_in, 1, 1) -> (C_in, C_out). No lane padding: padding 40 -> 128
    # columns would triple the per-call weight DMA, the only real data movement.
    w_mat = jnp.transpose(weight.reshape(c_out, c_in)).astype(param_dtype)
    b_row = bias.reshape(1, c_out).astype(jnp.float32)

    @jax.jit
    def forward(x_nchw):
        n, cin, h, w = x_nchw.shape
        m = n * h * w
        if h == 1 and w == 1:
            # Pure bitcast (no transpose / copy) for the 1x1-spatial case.
            x_rows = x_nchw.reshape(m, cin)
        else:
            x_rows = jnp.transpose(x_nchw, (0, 2, 3, 1)).reshape(m, cin)

        out_rows = pl.pallas_call(
            _conv1x1_kernel,
            # Real, unpadded output -> single masked vst in-kernel, and the
            # post-kernel reshape below is a bitcast (no slice fusion).
            out_shape=jax.ShapeDtypeStruct((m, c_out), jnp.float32),
            # Gridless call: whole arrays resident in VMEM (footprint < 0.5 MB).
            in_specs=[
                pl.BlockSpec(memory_space=pltpu.MemorySpace.VMEM),
                pl.BlockSpec(memory_space=pltpu.MemorySpace.VMEM),
                pl.BlockSpec(memory_space=pltpu.MemorySpace.VMEM),
            ],
            out_specs=pl.BlockSpec(memory_space=pltpu.MemorySpace.VMEM),
        )(x_rows, w_mat, b_row)

        if h == 1 and w == 1:
            return out_rows.reshape(n, c_out, 1, 1)
        return jnp.transpose(out_rows.reshape(n, h, w, c_out), (0, 3, 1, 2))

    return forward


if __name__ == "__main__":
    key = jax.random.PRNGKey(0)
    k_x, k_w, k_b = jax.random.split(key, 3)

    C_IN, C_OUT = 640, 40
    # Input matching the module's forward: [1, 640, 1, 1]
    x121 = jax.random.normal(k_x, (1, C_IN, 1, 1), dtype=jnp.float32)

    # Deterministic PyTorch-like init: uniform(-k, k), k = 1/sqrt(fan_in)
    fan_in = C_IN * 1 * 1
    bound = 1.0 / (fan_in ** 0.5)
    weight = jax.random.uniform(k_w, (C_OUT, C_IN, 1, 1),
                                minval=-bound, maxval=bound, dtype=jnp.float32)
    bias = jax.random.uniform(k_b, (C_OUT,),
                              minval=-bound, maxval=bound, dtype=jnp.float32)

    # Pure-JAX reference
    ref = (jnp.einsum("nchw,oc->nohw", x121, weight.reshape(C_OUT, C_IN))
           + bias.reshape(1, C_OUT, 1, 1))

    # Default f32 path (tight check).
    conv = make_conv2d_1x1(weight, bias)            # one-time param prep
    out = jax.block_until_ready(conv(x121))
    assert out.shape == (1, C_OUT, 1, 1)
    assert jnp.allclose(out, ref, atol=1e-5, rtol=1e-5)

    # Optional bf16-weight path (halved weight DMA; intended for v5e).
    conv_bf16 = make_conv2d_1x1(weight, bias, param_dtype=jnp.bfloat16)
    out_bf16 = jax.block_until_ready(conv_bf16(x121))
    assert out_bf16.shape == (1, C_OUT, 1, 1)
    assert jnp.allclose(out_bf16, ref, atol=5e-2, rtol=5e-2)

    print("KERNEL_OK")
</pallas_src>

<mosaic_0001>
module attributes {stable_mosaic.version = 11 : i64} {
  func.func @_conv1x1_kernel(%arg0: memref<1x640xf32, #tpu.memory_space<vmem>>, %arg1: memref<640x40xf32, #tpu.memory_space<vmem>>, %arg2: memref<1x40xf32, #tpu.memory_space<vmem>>, %arg3: memref<1x40xf32, #tpu.memory_space<vmem>>) attributes {dimension_semantics = [], scalar_prefetch = 0 : i64, scratch_operands = 0 : i64, tpu.core_type = #tpu.core_type<tc>} {
    %c0 = arith.constant 0 : index
    %c0_0 = arith.constant 0 : index
    %0 = vector.load %arg0[%c0, %c0_0] : memref<1x640xf32, #tpu.memory_space<vmem>>, vector<1x640xf32>
    %c0_1 = arith.constant 0 : index
    %c0_2 = arith.constant 0 : index
    %1 = vector.load %arg1[%c0_1, %c0_2] : memref<640x40xf32, #tpu.memory_space<vmem>>, vector<640x40xf32>
    %cst = arith.constant dense<0.000000e+00> : vector<1x40xf32>
    %2 = tpu.matmul %0, %1, %cst {dimension_numbers = #tpu.dot_dimension_numbers<[1], [0], [0], [1], [0, 0, 1, 1], [], []>} : vector<1x640xf32>, vector<640x40xf32>, vector<1x40xf32> -> vector<1x40xf32>
    %c0_3 = arith.constant 0 : index
    %c0_4 = arith.constant 0 : index
    %3 = vector.load %arg2[%c0_3, %c0_4] : memref<1x40xf32, #tpu.memory_space<vmem>>, vector<1x40xf32>
    %4 = arith.addf %2, %3 : vector<1x40xf32>
    %c0_5 = arith.constant 0 : index
    %c0_6 = arith.constant 0 : index
    %5 = vector.load %arg3[%c0_5, %c0_6] : memref<1x40xf32, #tpu.memory_space<vmem>>, vector<1x40xf32>
    tpu.vector_store %arg3[%c0_5, %c0_6], %4 {strides = array<i32>} : memref<1x40xf32, #tpu.memory_space<vmem>>, vector<1x40xf32>,
    return
  }
}

</mosaic_0001>

<bundles_post_ra>
// kernel: forward.1
= control target key start
LH: loop header
LB: loop body
LE: loop exit
PB: predicated region body
PF: predicated region fallthrough
CT: control target
= control target key end

     0   :  { %8 = vsyncpa [#allocation3], 0  ;;  %s755_s0 = inlined_call_operand.hbm [shape: f32[1,640], index: 0, kind: input, shape index: {}]   ;;  %s756_s1 = inlined_call_operand.hbm [shape: f32[640,40], index: 1, kind: input, shape index: {}]   ;;  %s757_s2 = inlined_call_operand.vmem [shape: f32[1,40], index: 2, kind: input, shape index: {}]   ;;  %s758_s3 = inlined_call_operand.hbm [shape: f32[1,40], index: 3, kind: output, shape index: {}]  }
   0x1   :  { %9 = vsyncpa [#allocation6], 0 }
   0x2   :  { %10 = vsyncpa [#allocation4], 0  ;;  %s667_s12 = smov [#allocation2]   ;;  %s668_s14 = smov [#allocation5]  }
   0x3   :  { %s17_s13 = sshll.u32 %s667_s12, 4  ;;  %s26_s15 = sshll.u32 %s668_s14, 4  ;;  %s18_s13 = int_to_ptr.vmem [resolvable:$true] %s17_s13  ;;  %s695_s15 = int_to_ptr.vmem [resolvable:$true] %s26_s15 }
   0x4   :  { %s595_s18 = scalar_lea.hbm %s755_s0, 80 }
   0x5   :  { %p596_p0 = scmp.ne.s32.totalorder %s755_s0, %s595_s18  ;;  %p599_p1 = scmp.lt.u32.totalorder %s595_s18, %s755_s0 }
   0x7   :  { %p601_p2 = pnand %p599_p1, %p596_p0 }
   0x9   :  { %604 = shalt.err (!%p601_p2)
}
   0xa   :  { %s605_s23 = scalar_lea.vmem %s18_s13, 80  ;;  %s609_s24 = scalar_lea.vmem %s18_s13, 96 }
   0xb   :  { %p606_p3 = scmp.ne.s32.totalorder %s18_s13, %s605_s23  ;;  %p610_p4 = scmp.lt.s32.totalorder %s18_s13, %s18_s13 }
   0xc   :  { %p611_p5 = scmp.lt.s32.totalorder %s609_s24, %s605_s23 }
   0xe   :  { %p612_p6 = por %p611_p5, %p610_p4 }
  0x10   :  { %p613_p7 = pnand %p612_p6, %p606_p3 }
  0x12   :  { %616 = shalt.err (!%p613_p7)
}
  0x13   :  { %20 = dma.hbm_to_vmem [thread:$0]  %s755_s0, 80, %s18_s13, [#allocation3]  }
  0x14   :  { %s617_s29 = scalar_lea.hbm %s756_s1, 10240 }
  0x15   :  { %p618_p8 = scmp.ne.s32.totalorder %s756_s1, %s617_s29  ;;  %p621_p9 = scmp.lt.u32.totalorder %s617_s29, %s756_s1 }
  0x17   :  { %p623_p10 = pnand %p621_p9, %p618_p8 }
  0x19   :  { %626 = shalt.err (!%p623_p10)
}
  0x1a   :  { %s627_s7 = scalar_lea.vmem %s695_s15, 10240  ;;  %p632_p12 = scmp.lt.s32.totalorder %s695_s15, %s695_s15 }
  0x1b   :  { %p628_p11 = scmp.ne.s32.totalorder %s695_s15, %s627_s7  ;;  %p633_p13 = scmp.lt.s32.totalorder %s627_s7, %s627_s7 }
  0x1d   :  { %p634_p0 = por %p633_p13, %p632_p12 }
  0x1f   :  { %p635_p1 = pnand %p634_p0, %p628_p11 }
  0x21   :  { %638 = shalt.err (!%p635_p1)
}
  0x22   :  { %s669_s0 = smov 128   ;;  %s670_s8 = smov 8  }
  0x23   :  { %32 = dma.hbm_to_vmem [thread:$0]  %s756_s1, 10240, %s695_s15, [#allocation6], %s669_s0, %s669_s0, %s670_s8  }
  0x24   :  { %661 = dma.done.wait [#allocation3], 80  }
  0x25   :  { %662 = vsyncadd [#allocation3], 4294967216 }
  0x26   :  { %663 = dma.done.wait [#allocation6], 10240  }
  0x27   :  { %664 = vsyncadd [#allocation6], 4294957056  ;;  %v58_v0 = vld [vmem:[#allocation5 + $0x80] sm:$0xff]  ;;  %v59_v1 = vld [vmem:[#allocation5 + $0x88] sm:$0xff]  ;;  %v124_v43 = vlaneseq  ;;  %vm672_vm0 = vmmov 0   ;;  %s674_s12 = smov [#allocation7]  }
  0x28   :  { %v42_v2 = vld [vmem:[#allocation5] sm:$0xff]  ;;  %v499_v3 = vpack.c.bf16 %v59_v1, %v58_v0  ;;  %v43_v4 = vld [vmem:[#allocation5 + $0x8] sm:$0xff]  ;;  %v60_v11 = vld [vmem:[#allocation5 + $0x90] sm:$0xff]  ;;  %s367_s13 = sshll.u32 %s674_s12, 4  ;;  %vm359_vm1 = vcmask 319488   ;;  %s368_s13 = int_to_ptr.vmem [resolvable:$true] %s367_s13 }
  0x29   :  { %v90_v5 = vld [vmem:[#allocation5 + $0x180] sm:$0xff]  ;;  %v91_v6 = vld [vmem:[#allocation5 + $0x188] sm:$0xff]  ;;  %v501_v7 = vpack.c.bf16 %v43_v4, %v42_v2  ;;  %v61_v13 = vld [vmem:[#allocation5 + $0x98] sm:$0xff]  ;;  %v726_v57 = vshrl.u32 %v124_v43, 7  ;;  %s639_s14 = scalar_lea.vmem %s368_s13, 16  ;;  %s643_s15 = scalar_lea.vmem %s368_s13, 32 }
  0x2a   :  { %v531_v8 = vpack.c.bf16 %v91_v6, %v90_v5  ;;  %v74_v9 = vld [vmem:[#allocation5 + $0x100] sm:$0xff]  ;;  %v75_v10 = vld [vmem:[#allocation5 + $0x108] sm:$0xff]  ;;  %500 = vmatprep.subr.bf16.mxu0 %v499_v3  ;;  %v44_v14 = vld [vmem:[#allocation5 + $0x10] sm:$0xff]  ;;  %v503_v16 = vpack.c.bf16 %v61_v13, %v60_v11  ;;  %p640_p2 = scmp.ne.s32.totalorder %s368_s13, %s639_s14  ;;  %p644_p3 = scmp.lt.s32.totalorder %s368_s13, %s368_s13 }
  0x2b   :  { %v533_v12 = vpack.c.bf16 %v75_v10, %v74_v9  ;;  %v45_v15 = vld [vmem:[#allocation5 + $0x18] sm:$0xff]  ;;  %502 = vmatpush3.bf16.msra.mxu0 %v501_v7  ;;  %v92_v18 = vld [vmem:[#allocation5 + $0x190] sm:$0xff]  ;;  %v62_v23 = vld [vmem:[#allocation5 + $0xa0] sm:$0xff]  ;;  %v130_v6 = vsub.s32 1, %v726_v57  ;;  %v138_v11 = vsub.s32 3, %v726_v57  ;;  %p645_p4 = scmp.lt.s32.totalorder %s643_s15, %s639_s14 }
  0x2c   :  { %532 = vmatprep.subr.bf16.mxu1 %v531_v8  ;;  %v505_v17 = vpack.c.bf16 %v45_v15, %v44_v14  ;;  %v93_v19 = vld [vmem:[#allocation5 + $0x198] sm:$0xff]  ;;  %v76_v20 = vld [vmem:[#allocation5 + $0x110] sm:$0xff]  ;;  %v63_v24 = vld [vmem:[#allocation5 + $0xa8] sm:$0xff]  ;;  %504 = vmatprep.subr.bf16.mxu0 %v503_v16 }
  0x2d   :  { %534 = vmatpush3.bf16.msra.mxu1 %v533_v12  ;;  %v535_v21 = vpack.c.bf16 %v93_v19, %v92_v18  ;;  %v77_v22 = vld [vmem:[#allocation5 + $0x118] sm:$0xff]  ;;  %v507_v26 = vpack.c.bf16 %v63_v24, %v62_v23  ;;  %v46_v27 = vld [vmem:[#allocation5 + $0x20] sm:$0xff]  ;;  %v47_v28 = vld [vmem:[#allocation5 + $0x28] sm:$0xff]  ;;  %p646_p5 = por %p645_p4, %p644_p3 }
  0x2e   :  { %v537_v25 = vpack.c.bf16 %v77_v22, %v76_v20  ;;  %v94_v29 = vld [vmem:[#allocation5 + $0x1a0] sm:$0xff]  ;;  %v95_v30 = vld [vmem:[#allocation5 + $0x1a8] sm:$0xff]  ;;  %v509_v33 = vpack.c.bf16 %v47_v28, %v46_v27  ;;  %v64_v35 = vld [vmem:[#allocation5 + $0xb0] sm:$0xff] }
  0x2f   :  { %536 = vmatprep.subr.bf16.mxu1 %v535_v21  ;;  %v78_v31 = vld [vmem:[#allocation5 + $0x120] sm:$0xff]  ;;  %v79_v32 = vld [vmem:[#allocation5 + $0x128] sm:$0xff]  ;;  %506 = vmatpush3.bf16.msra.mxu0 %v505_v17  ;;  %v539_v34 = vpack.c.bf16 %v95_v30, %v94_v29  ;;  %v65_v36 = vld [vmem:[#allocation5 + $0xb8] sm:$0xff]  ;;  %p647_p6 = pnand %p646_p5, %p640_p2 }
  0x30   :  { %v48_v37 = vld [vmem:[#allocation5 + $0x30] sm:$0xff]  ;;  %508 = vmatprep.subr.bf16.mxu0 %v507_v26  ;;  %v541_v38 = vpack.c.bf16 %v79_v32, %v78_v31  ;;  %v511_v39 = vpack.c.bf16 %v65_v36, %v64_v35  ;;  %v49_v40 = vld [vmem:[#allocation5 + $0x38] sm:$0xff]  ;;  %v66_v47 = vld [vmem:[#allocation5 + $0xc0] sm:$0xff] }
  0x31   :  { %538 = vmatpush3.bf16.msra.mxu1 %v537_v25  ;;  %v96_v41 = vld [vmem:[#allocation5 + $0x1b0] sm:$0xff]  ;;  %v97_v42 = vld [vmem:[#allocation5 + $0x1b8] sm:$0xff]  ;;  %v67_v48 = vld [vmem:[#allocation5 + $0xc8] sm:$0xff]  ;;  %v513_v49 = vpack.c.bf16 %v49_v40, %v48_v37  ;;  %v126_v37 = vsub.s32 0, %v726_v57 }
  0x32   :  { %540 = vmatprep.subr.bf16.mxu1 %v539_v34  ;;  %v543_v44 = vpack.c.bf16 %v97_v42, %v96_v41  ;;  %v80_v45 = vld [vmem:[#allocation5 + $0x130] sm:$0xff]  ;;  %v81_v46 = vld [vmem:[#allocation5 + $0x138] sm:$0xff]  ;;  %v98_v50 = vld [vmem:[#allocation5 + $0x1c0] sm:$0xff]  ;;  %v515_v53 = vpack.c.bf16 %v67_v48, %v66_v47 }
  0x33   :  { %510 = vmatpush3.bf16.msra.mxu0 %v509_v33  ;;  %v99_v51 = vld [vmem:[#allocation5 + $0x1c8] sm:$0xff]  ;;  %v545_v52 = vpack.c.bf16 %v81_v46, %v80_v45  ;;  %v50_v54 = vld [vmem:[#allocation5 + $0x40] sm:$0xff]  ;;  %v68_v60 = vld [vmem:[#allocation5 + $0xd0] sm:$0xff]  ;;  %v671_v46 = vmov 0.0|0.0  }
  0x34   :  { %512 = vmatprep.subr.bf16.mxu0 %v511_v39  ;;  %v51_v55 = vld [vmem:[#allocation5 + $0x48] sm:$0xff]  ;;  %v82_v56 = vld [vmem:[#allocation5 + $0x140] sm:$0xff]  ;;  %v547_v58 = vpack.c.bf16 %v99_v51, %v98_v50  ;;  %v69_v61 = vld [vmem:[#allocation5 + $0xd8] sm:$0xff]  ;;  %v134_v39 = vsub.s32 2, %v726_v57 }
  0x35   :  { %542 = vmatpush3.bf16.msra.mxu1 %v541_v38  ;;  %v83_v59 = vld [vmem:[#allocation5 + $0x148] sm:$0xff]  ;;  %v100_v62 = vld [vmem:[#allocation5 + $0x1d0] sm:$0xff]  ;;  %v101_v63 = vld [vmem:[#allocation5 + $0x1d8] sm:$0xff]  ;;  %v517_v0 = vpack.c.bf16 %v51_v55, %v50_v54  ;;  %v519_v2 = vpack.c.bf16 %v69_v61, %v68_v60 }
  0x36   :  { %544 = vmatprep.subr.bf16.mxu1 %v543_v44  ;;  %v549_v1 = vpack.c.bf16 %v83_v59, %v82_v56  ;;  %v52_v3 = vld [vmem:[#allocation5 + $0x50] sm:$0xff]  ;;  %v53_v4 = vld [vmem:[#allocation5 + $0x58] sm:$0xff]  ;;  %v551_v7 = vpack.c.bf16 %v101_v63, %v100_v62  ;;  %v70_v9 = vld [vmem:[#allocation5 + $0xe0] sm:$0xff] }
  0x37   :  { %514 = vmatpush3.bf16.msra.mxu0 %v513_v49  ;;  %v84_v5 = vld [vmem:[#allocation5 + $0x150] sm:$0xff]  ;;  %v85_v8 = vld [vmem:[#allocation5 + $0x158] sm:$0xff]  ;;  %v71_v10 = vld [vmem:[#allocation5 + $0xe8] sm:$0xff]  ;;  %v521_v14 = vpack.c.bf16 %v53_v4, %v52_v3 }
  0x38   :  { %516 = vmatprep.subr.bf16.mxu0 %v515_v53  ;;  %v102_v12 = vld [vmem:[#allocation5 + $0x1e0] sm:$0xff]  ;;  %v103_v13 = vld [vmem:[#allocation5 + $0x1e8] sm:$0xff]  ;;  %v730_v15 = vld [vmem:[#allocation2] sm:$0x1f]  ;;  %v553_v16 = vpack.c.bf16 %v85_v8, %v84_v5  ;;  %v523_v17 = vpack.c.bf16 %v71_v10, %v70_v9  ;;  %v142_v5 = vsub.s32 4, %v726_v57 }
  0x39   :  { %546 = vmatpush3.bf16.msra.mxu1 %v545_v52  ;;  %v54_v18 = vld [vmem:[#allocation5 + $0x60] sm:$0xff]  ;;  %v55_v19 = vld [vmem:[#allocation5 + $0x68] sm:$0xff]  ;;  %v131_v21 = vrot.slane %v730_v15, %v130_v6  ;;  %v555_v22 = vpack.c.bf16 %v103_v13, %v102_v12  ;;  %v72_v24 = vld [vmem:[#allocation5 + $0xf0] sm:$0xff]  ;;  %v139_v26 = vrot.slane %v730_v15, %v138_v11  ;;  %v127_v43 = vrot.slane %v730_v15, %v126_v37 }
  0x3a   :  { %548 = vmatprep.subr.bf16.mxu1 %v547_v58  ;;  %v86_v20 = vld [vmem:[#allocation5 + $0x160] sm:$0xff]  ;;  %v87_v23 = vld [vmem:[#allocation5 + $0x168] sm:$0xff]  ;;  %v73_v25 = vld [vmem:[#allocation5 + $0xf8] sm:$0xff]  ;;  %v525_v29 = vpack.c.bf16 %v55_v19, %v54_v18  ;;  %v135_v45 = vrot.slane %v730_v15, %v134_v39  ;;  %v673_v52 = vmov 0.0  }
  0x3b   :  { %518 = vmatpush3.bf16.msra.mxu0 %v517_v0  ;;  %v104_v27 = vld [vmem:[#allocation5 + $0x1f0] sm:$0xff]  ;;  %v105_v28 = vld [vmem:[#allocation5 + $0x1f8] sm:$0xff]  ;;  %213 = vmatprep.mubr.f32.mxu0 %v131_v21  ;;  %v557_v30 = vpack.c.bf16 %v87_v23, %v86_v20  ;;  %v527_v31 = vpack.c.bf16 %v73_v25, %v72_v24  ;;  %v106_v41 = vld [vmem:[#allocation5 + $0x200] sm:$0xff] }
  0x3c   :  { %520 = vmatprep.subr.bf16.mxu0 %v519_v2  ;;  %283 = vmatprep.mubr.f32.mxu1 %v139_v26  ;;  %v56_v32 = vld [vmem:[#allocation5 + $0x70] sm:$0xff]  ;;  %v57_v33 = vld [vmem:[#allocation5 + $0x78] sm:$0xff]  ;;  %v559_v34 = vpack.c.bf16 %v105_v28, %v104_v27  ;;  %v107_v42 = vld [vmem:[#allocation5 + $0x208] sm:$0xff] }
  0x3d   :  { %550 = vmatpush3.bf16.msra.mxu1 %v549_v1  ;;  %v88_v35 = vld [vmem:[#allocation5 + $0x170] sm:$0xff]  ;;  %v89_v36 = vld [vmem:[#allocation5 + $0x178] sm:$0xff]  ;;  %v529_v38 = vpack.c.bf16 %v57_v33, %v56_v32  ;;  %v564_v44 = vpack.c.bf16 %v107_v42, %v106_v41  ;;  %v110_v50 = vld [vmem:[#allocation5 + $0x220] sm:$0xff] }
  0x3e   :  { %552 = vmatprep.subr.bf16.mxu1 %v551_v7  ;;  %v561_v40 = vpack.c.bf16 %v89_v36, %v88_v35  ;;  %v108_v47 = vld [vmem:[#allocation5 + $0x210] sm:$0xff]  ;;  %v109_v48 = vld [vmem:[#allocation5 + $0x218] sm:$0xff]  ;;  %v111_v51 = vld [vmem:[#allocation5 + $0x228] sm:$0xff]  ;;  %v143_v7 = vrot.slane %v730_v15, %v142_v5 }
  0x3f   :  { %522 = vmatpush3.bf16.msra.mxu0 %v521_v14  ;;  %v567_v49 = vpack.c.bf16 %v109_v48, %v108_v47  ;;  %v570_v53 = vpack.c.bf16 %v111_v51, %v110_v50  ;;  %v112_v54 = vld [vmem:[#allocation5 + $0x230] sm:$0xff]  ;;  %v113_v55 = vld [vmem:[#allocation5 + $0x238] sm:$0xff]  ;;  %v114_v58 = vld [vmem:[#allocation5 + $0x240] sm:$0xff] }
  0x40   :  { %524 = vmatprep.subr.bf16.mxu0 %v523_v17  ;;  %v573_v56 = vpack.c.bf16 %v113_v55, %v112_v54  ;;  %v115_v59 = vld [vmem:[#allocation5 + $0x248] sm:$0xff]  ;;  %v116_v61 = vld [vmem:[#allocation5 + $0x250] sm:$0xff]  ;;  %v117_v62 = vld [vmem:[#allocation5 + $0x258] sm:$0xff] }
  0x41   :  { %554 = vmatpush3.bf16.msra.mxu1 %v553_v16  ;;  %v576_v60 = vpack.c.bf16 %v115_v59, %v114_v58  ;;  %v579_v63 = vpack.c.bf16 %v117_v62, %v116_v61  ;;  %v118_v0 = vld [vmem:[#allocation5 + $0x260] sm:$0xff]  ;;  %v119_v1 = vld [vmem:[#allocation5 + $0x268] sm:$0xff]  ;;  %v120_v3 = vld [vmem:[#allocation5 + $0x270] sm:$0xff] }
  0x42   :  { %556 = vmatprep.subr.bf16.mxu1 %v555_v22  ;;  %v582_v2 = vpack.c.bf16 %v119_v1, %v118_v0  ;;  %v121_v4 = vld [vmem:[#allocation5 + $0x278] sm:$0xff] }
  0x43   :  { %526 = vmatpush3.bf16.msra.mxu0 %v525_v29  ;;  %v585_v6 = vpack.c.bf16 %v121_v4, %v120_v3  ;;  %v122_v9 = vld [vmem:[%s757_s2] sm:$0x1] }
  0x44   :  { %528 = vmatprep.subr.bf16.mxu0 %v527_v31 }
  0x45   :  { %558 = vmatpush3.bf16.msra.mxu1 %v557_v30 }
  0x46   :  { %560 = vmatprep.subr.bf16.mxu1 %v559_v34 }
  0x47   :  { %530 = vmatpush3.bf16.msra.mxu0 %v529_v38 }
  0x48   :  { %563 = vmatprep.subr.bf16.mxu0 %v671_v46 }
  0x49   :  { %562 = vmatpush3.bf16.msra.mxu1 %v561_v40 }
  0x4a   :  { %214 = vmatmul.mubr.f32.vlgmr.msra.gmra.mrb[0].mxu0 %v127_v43 }
  0x4b   :  { %565 = vmatpush3.bf16.msra.mxu0 %v564_v44  ;;  %496 = vmatprep.mubr.msk.f32.mxu0 %vm672_vm0, %v673_v52 }
  0x4c   :  { %284 = vmatmul.mubr.f32.vlgmr.msra.gmra.mrb[0].mxu1 %v135_v45  ;;  %566 = vmatprep.subr.bf16.mxu0 %v671_v46 }
  0x4f   :  { %568 = vmatpush3.bf16.msra.mxu0 %v567_v49 }
  0x50   :  { %569 = vmatprep.subr.bf16.mxu0 %v671_v46 }
  0x53   :  { %571 = vmatpush3.bf16.msra.mxu0 %v570_v53 }
  0x54   :  { %572 = vmatprep.subr.bf16.mxu0 %v671_v46 }
  0x57   :  { %574 = vmatpush3.bf16.msra.mxu0 %v573_v56 }
  0x58   :  { %575 = vmatprep.subr.bf16.mxu0 %v671_v46 }
  0x5b   :  { %577 = vmatpush3.bf16.msra.mxu0 %v576_v60 }
  0x5c   :  { %578 = vmatprep.subr.bf16.mxu0 %v671_v46 }
  0x5f   :  { %580 = vmatpush3.bf16.msra.mxu0 %v579_v63 }
  0x60   :  { %581 = vmatprep.subr.bf16.mxu0 %v671_v46 }
  0x63   :  { %583 = vmatpush3.bf16.msra.mxu0 %v582_v2 }
  0x64   :  { %584 = vmatprep.subr.bf16.mxu0 %v671_v46 }
  0x67   :  { %586 = vmatpush3.bf16.msra.mxu0 %v585_v6 }
  0x6a   :  { %497 = vmatmul.mubr.f32.vlgmr.msra.gmra.mrb[2].mxu0 %v143_v7 }
 0x11d   :  { %v409_v8 = vpop.f32.mrb[0].mxu0 }
 0x11e   :  { %v410_v10 = vpop.f32.mrb[1].mxu0 }
 0x11f   :  { %v444_v11 = vpop.f32.mrb[0].mxu1  ;;  %v411_v12 = vadd.f32 %v410_v10, %v409_v8 }
 0x120   :  { %v445_v13 = vpop.f32.mrb[1].mxu1 }
 0x121   :  { %v446_v14 = vadd.f32 %v445_v13, %v444_v11  ;;  %v216_v16 = vadd.f32 %v411_v12, %v122_v9 }
 0x123   :  { %v286_v17 = vadd.f32 %v446_v14, %v216_v16 }
 0x13d   :  { %v355_v57 = vpop.f32.mrb[2].mxu0 }
 0x13e   :  { %v356_v18 = vadd.f32 %v355_v57, %v286_v17  ;;  %v498_v15 = vpop.f32.mrb[3].mxu0 }
 0x140   :  { %360 = vst.msk [vmem:[#allocation7] sm:$0x1] %vm359_vm1, %v356_v18 }
 0x141   :  { %650 = shalt.err (!%p647_p6)
}
 0x142   :  { %s651_s17 = scalar_lea.hbm %s758_s3, 16 }
 0x143   :  { %p652_p7 = scmp.ne.s32.totalorder %s758_s3, %s651_s17  ;;  %p655_p8 = scmp.lt.u32.totalorder %s651_s17, %s758_s3 }
 0x145   :  { %p657_p9 = pnand %p655_p8, %p652_p7 }
 0x147   :  { %660 = shalt.err (!%p657_p9)
}
 0x148   :  { %370 = dma.vmem_to_hbm [thread:$0]  %s368_s13, 16, %s758_s3, [#allocation4]  }
 0x149   :  { %665 = dma.done.wait [#allocation4], 16  }
 0x14a   :  { %666 = vsyncadd [#allocation4], 4294967280 }
 0x14b   :  { %374 = vsyncpa [#allocation3], 1 }
 0x14c   :  { %375 = vsyncpa [#allocation6], 1 }
 0x14d   :  { %376 = vsyncpa [#allocation4], 1 }

</bundles_post_ra>
